<compile_context>
chip_gen: v6e
topology: v6e:2x2x1
jax: 0.10.0
libtpu: 0.0.40
codegen_flags: <defaults>
</compile_context>

<pallas_src>
import jax
import jax.numpy as jnp
from jax.experimental import pallas as pl
from jax.experimental.pallas import tpu as pltpu

IN_FEATURES = 128
OUT_FEATURES = 256

TM = 2048             # batch tile for the gridded path (multiple of 8)
NO_GRID_MAX_B = 4096  # up to here: single invocation, everything resident in VMEM


def linear_hardswish_kernel(x_ref, w_ref, b_ref, o_ref):
    # bf16 x bf16 -> f32 accumulate on the MXU (native path on all generations).
    x_bf = x_ref[...].astype(jnp.bfloat16)
    l1 = jnp.dot(x_bf, w_ref[...], preferred_element_type=jnp.float32)
    l1 = l1 + b_ref[...]                       # bias kept f32, single VPU add
    gate = jnp.clip(l1 + 3.0, 0.0, 6.0)        # hardswish gate
    o_ref[...] = (l1 * gate * (1.0 / 6.0)).astype(o_ref.dtype)


def linear_hardswish(x, w_t_bf16, b2d, *, out_dtype=jnp.float32):
    """x: (B, IN) f32, w_t_bf16: (IN, OUT) bf16, b2d: (1, OUT) f32 -> (B, OUT)."""
    B = x.shape[0]
    out_shape = jax.ShapeDtypeStruct((B, OUT_FEATURES), out_dtype)

    cost = pl.CostEstimate(
        flops=2 * B * IN_FEATURES * OUT_FEATURES + 4 * B * OUT_FEATURES,
        transcendentals=0,
        bytes_accessed=(x.size * x.dtype.itemsize
                        + w_t_bf16.size * w_t_bf16.dtype.itemsize
                        + b2d.size * b2d.dtype.itemsize
                        + B * OUT_FEATURES * jnp.dtype(out_dtype).itemsize),
    )

    if B <= NO_GRID_MAX_B:
        # Small/medium problem: no grid, no pipeline machinery.
        # Max live set at B=4096: x 2 MiB + out 4 MiB + weight 64 KiB -> ~6 MiB.
        vmem = pltpu.MemorySpace.VMEM
        return pl.pallas_call(
            linear_hardswish_kernel,
            out_shape=out_shape,
            in_specs=[
                pl.BlockSpec(memory_space=vmem),
                pl.BlockSpec(memory_space=vmem),
                pl.BlockSpec(memory_space=vmem),
            ],
            out_specs=pl.BlockSpec(memory_space=vmem),
            cost_estimate=cost,
        )(x, w_t_bf16, b2d)

    # Large-batch path: tile over B, weight/bias resident via constant index_map.
    # Per step: x 1 MiB + out 2 MiB (+64 KiB weight), ~6.2 MiB double-buffered.
    return pl.pallas_call(
        linear_hardswish_kernel,
        out_shape=out_shape,
        grid=(pl.cdiv(B, TM),),
        in_specs=[
            pl.BlockSpec((TM, IN_FEATURES), lambda i: (i, 0)),
            pl.BlockSpec((IN_FEATURES, OUT_FEATURES), lambda i: (0, 0)),
            pl.BlockSpec((1, OUT_FEATURES), lambda i: (0, 0)),
        ],
        out_specs=pl.BlockSpec((TM, OUT_FEATURES), lambda i: (i, 0)),
        compiler_params=pltpu.CompilerParams(
            # TODO(synk): on v7x, pltpu.CORE_PARALLEL (or core_map over a 2-TC mesh)
            # would actually shard this axis across both TensorCores; kept "parallel"
            # here for portability across v5e/v6e/v7x.
            dimension_semantics=("parallel",),
            vmem_limit_bytes=32 << 20,
        ),
        cost_estimate=cost,
    )(x, w_t_bf16, b2d)


def _reference(x, w_t_bf16, b2d):
    """Plain-JAX reference using the same bf16 weight quantization as the kernel."""
    l1 = jnp.dot(x.astype(jnp.bfloat16), w_t_bf16,
                 preferred_element_type=jnp.float32) + b2d
    return l1 * jnp.clip(l1 + 3.0, 0.0, 6.0) / 6.0


if __name__ == "__main__":
    key = jax.random.PRNGKey(0)
    kx, kw, kb, kxm, kxb = jax.random.split(key, 5)

    # Input matches the PyTorch module: x1 = torch.randn(1, 128)
    x = jax.random.normal(kx, (1, IN_FEATURES), dtype=jnp.float32)

    # Deterministic parameter init mimicking torch.nn.Linear defaults:
    # U(-1/sqrt(fan_in), 1/sqrt(fan_in))
    bound = 1.0 / jnp.sqrt(jnp.float32(IN_FEATURES))
    w = jax.random.uniform(kw, (OUT_FEATURES, IN_FEATURES),
                           minval=-bound, maxval=bound, dtype=jnp.float32)
    b = jax.random.uniform(kb, (OUT_FEATURES,),
                           minval=-bound, maxval=bound, dtype=jnp.float32)

    w_t_bf16 = jnp.transpose(w).astype(jnp.bfloat16)   # (IN, OUT) bf16 for x @ W
    b2d = b.reshape(1, OUT_FEATURES)

    # --- B=1 path (matches the PyTorch module's input) ---
    out = jax.block_until_ready(linear_hardswish(x, w_t_bf16, b2d))
    ref = _reference(x, w_t_bf16, b2d)
    assert out.shape == (1, OUT_FEATURES)
    assert jnp.allclose(out, ref, atol=1e-3, rtol=1e-3)

    # --- Medium batch: exercises the widened no-grid (resident VMEM) path ---
    xm = jax.random.normal(kxm, (300, IN_FEATURES), dtype=jnp.float32)
    out_m = jax.block_until_ready(linear_hardswish(xm, w_t_bf16, b2d))
    ref_m = _reference(xm, w_t_bf16, b2d)
    assert out_m.shape == (300, OUT_FEATURES)
    assert jnp.allclose(out_m, ref_m, atol=1e-3, rtol=1e-3)

    # --- Large ragged batch: exercises the gridded path incl. partial last tile ---
    Bb = NO_GRID_MAX_B + TM + 17   # B % TM != 0 -> masked writes on the last block
    xb = jax.random.normal(kxb, (Bb, IN_FEATURES), dtype=jnp.float32)
    out_b = jax.block_until_ready(linear_hardswish(xb, w_t_bf16, b2d))
    ref_b = _reference(xb, w_t_bf16, b2d)
    assert out_b.shape == (Bb, OUT_FEATURES)
    assert jnp.allclose(out_b, ref_b, atol=1e-3, rtol=1e-3)

    print("KERNEL_OK")
</pallas_src>

<mosaic_0001>
module attributes {stable_mosaic.version = 11 : i64} {
  func.func @linear_hardswish_kernel(%arg0: memref<1x128xf32, #tpu.memory_space<vmem>>, %arg1: memref<128x256xbf16, #tpu.memory_space<vmem>>, %arg2: memref<1x256xf32, #tpu.memory_space<vmem>>, %arg3: memref<1x256xf32, #tpu.memory_space<vmem>>) attributes {dimension_semantics = [], scalar_prefetch = 0 : i64, scratch_operands = 0 : i64, tpu.core_type = #tpu.core_type<tc>} {
    %c0 = arith.constant 0 : index
    %c0_0 = arith.constant 0 : index
    %0 = vector.load %arg0[%c0, %c0_0] : memref<1x128xf32, #tpu.memory_space<vmem>>, vector<1x128xf32>
    %1 = arith.truncf %0 : vector<1x128xf32> to vector<1x128xbf16>
    %c0_1 = arith.constant 0 : index
    %c0_2 = arith.constant 0 : index
    %2 = vector.load %arg1[%c0_1, %c0_2] : memref<128x256xbf16, #tpu.memory_space<vmem>>, vector<128x256xbf16>
    %cst = arith.constant dense<0.000000e+00> : vector<1x256xf32>
    %3 = tpu.matmul %1, %2, %cst {dimension_numbers = #tpu.dot_dimension_numbers<[1], [0], [0], [1], [0, 0, 1, 1], [], []>} : vector<1x128xbf16>, vector<128x256xbf16>, vector<1x256xf32> -> vector<1x256xf32>
    %c0_3 = arith.constant 0 : index
    %c0_4 = arith.constant 0 : index
    %4 = vector.load %arg2[%c0_3, %c0_4] : memref<1x256xf32, #tpu.memory_space<vmem>>, vector<1x256xf32>
    %5 = arith.addf %3, %4 : vector<1x256xf32>
    %cst_5 = arith.constant 3.000000e+00 : f32
    %6 = vector.broadcast %cst_5 : f32 to vector<1x256xf32>
    %7 = arith.addf %5, %6 : vector<1x256xf32>
    %cst_6 = arith.constant 0.000000e+00 : f32
    %cst_7 = arith.constant 6.000000e+00 : f32
    %8 = vector.broadcast %cst_6 : f32 to vector<1x256xf32>
    %9 = arith.maximumf %8, %7 : vector<1x256xf32>
    %10 = vector.broadcast %cst_7 : f32 to vector<1x256xf32>
    %11 = arith.minimumf %10, %9 : vector<1x256xf32>
    %12 = arith.mulf %5, %11 : vector<1x256xf32>
    %cst_8 = arith.constant 0.166666672 : f32
    %13 = vector.broadcast %cst_8 : f32 to vector<1x256xf32>
    %14 = arith.mulf %12, %13 : vector<1x256xf32>
    %c0_9 = arith.constant 0 : index
    %c0_10 = arith.constant 0 : index
    %15 = vector.load %arg3[%c0_9, %c0_10] : memref<1x256xf32, #tpu.memory_space<vmem>>, vector<1x256xf32>
    tpu.vector_store %arg3[%c0_9, %c0_10], %14 {strides = array<i32>} : memref<1x256xf32, #tpu.memory_space<vmem>>, vector<1x256xf32>,
    return
  }
}

</mosaic_0001>

<bundles_post_ra>
// kernel: tpu_custom_call.1
= control target key start
LH: loop header
LB: loop body
LE: loop exit
PB: predicated region body
PF: predicated region fallthrough
CT: control target
= control target key end

     0   :  { %8 = vsyncpa [#allocation3], 0  ;;  %s394_s0 = inlined_call_operand.hbm [shape: f32[1,128], index: 0, kind: input, shape index: {}]   ;;  %s395_s1 = inlined_call_operand.hbm [shape: bf16[128,256], index: 1, kind: input, shape index: {}]   ;;  %s396_s2 = inlined_call_operand.vmem [shape: f32[1,256], index: 2, kind: input, shape index: {}]   ;;  %s397_s3 = inlined_call_operand.hbm [shape: f32[1,256], index: 3, kind: output, shape index: {}]  }
   0x1   :  { %9 = vsyncpa [#allocation6], 0 }
   0x2   :  { %10 = vsyncpa [#allocation4], 0  ;;  %s355_s12 = smov [#allocation2]   ;;  %s356_s14 = smov [#allocation5]  }
   0x3   :  { %s17_s13 = sshll.u32 %s355_s12, 4  ;;  %s26_s15 = sshll.u32 %s356_s14, 4  ;;  %s18_s13 = int_to_ptr.vmem [resolvable:$true] %s17_s13  ;;  %s27_s15 = int_to_ptr.vmem [resolvable:$true] %s26_s15 }
   0x4   :  { %s297_s16 = scalar_lea.vmem %s18_s13, 16  ;;  %s301_s17 = scalar_lea.vmem %s18_s13, 32 }
   0x5   :  { %p298_p0 = scmp.ne.s32.totalorder %s18_s13, %s297_s16  ;;  %p302_p1 = scmp.lt.s32.totalorder %s18_s13, %s18_s13 }
   0x6   :  { %p303_p2 = scmp.lt.s32.totalorder %s301_s17, %s297_s16 }
   0x8   :  { %p304_p3 = por %p303_p2, %p302_p1 }
   0xa   :  { %p305_p4 = pnand %p304_p3, %p298_p0 }
   0xc   :  { %308 = shalt.err (!%p305_p4)
}
   0xd   :  { %20 = dma.hbm_to_vmem [thread:$0]  %s394_s0, 16, %s18_s13, [#allocation3]  }
   0xe   :  { %s317_s20 = scalar_lea.vmem %s27_s15, 2048  ;;  %p322_p6 = scmp.lt.s32.totalorder %s27_s15, %s27_s15 }
   0xf   :  { %p318_p5 = scmp.ne.s32.totalorder %s27_s15, %s317_s20  ;;  %p323_p7 = scmp.lt.s32.totalorder %s317_s20, %s317_s20 }
  0x11   :  { %p324_p8 = por %p323_p7, %p322_p6 }
  0x13   :  { %p325_p9 = pnand %p324_p8, %p318_p5 }
  0x15   :  { %328 = shalt.err (!%p325_p9)
}
  0x16   :  { %s357_s21 = smov 128   ;;  %s358_s22 = smov 8  }
  0x17   :  { %32 = dma.hbm_to_vmem [thread:$0]  %s395_s1, 2048, %s27_s15, [#allocation6], %s357_s21, %s357_s21, %s358_s22  }
  0x18   :  { %349 = dma.done.wait [#allocation3], 16  }
  0x19   :  { %350 = vsyncadd [#allocation3], 4294967280 }
  0x1a   :  { %351 = dma.done.wait [#allocation6], 2048  }
  0x1b   :  { %352 = vsyncadd [#allocation6], 4294965248  ;;  %v359_v0 = vmov 0   ;;  %v265_v1 = vld [vmem:[#allocation5 + $0x74] ss:$8 sps:$4 sm:$0xff]   ;;  %v142_v19 = vlaneseq }
  0x1c   :  { %184 = vmatprep.mubr.bf16.mxu0 %v359_v0  ;;  %v267_v2 = vld [vmem:[#allocation5 + $0x70] ss:$8 sps:$4 sm:$0xff]   ;;  %152 = vmatprep.subr.bf16.mxu0 %v265_v1  ;;  %v268_v3 = vld [vmem:[#allocation5 + $0x64] ss:$8 sps:$4 sm:$0xff]   ;;  %v270_v4 = vld [vmem:[#allocation5 + $0x60] ss:$8 sps:$4 sm:$0xff]  }
  0x1d   :  { %153 = vmatpush1.bf16.msra.mxu0 %v267_v2  ;;  %v271_v5 = vld [vmem:[#allocation5 + $0x54] ss:$8 sps:$4 sm:$0xff]   ;;  %v273_v6 = vld [vmem:[#allocation5 + $0x50] ss:$8 sps:$4 sm:$0xff]   ;;  %v274_v7 = vld [vmem:[#allocation5 + $0x44] ss:$8 sps:$4 sm:$0xff]  }
  0x1e   :  { %154 = vmatprep.subr.bf16.mxu0 %v268_v3  ;;  %v276_v8 = vld [vmem:[#allocation5 + $0x40] ss:$8 sps:$4 sm:$0xff]   ;;  %v277_v9 = vld [vmem:[#allocation5 + $0x34] ss:$8 sps:$4 sm:$0xff]   ;;  %v279_v10 = vld [vmem:[#allocation5 + $0x30] ss:$8 sps:$4 sm:$0xff]  }
  0x1f   :  { %v280_v11 = vld [vmem:[#allocation5 + $0x24] ss:$8 sps:$4 sm:$0xff]   ;;  %v282_v12 = vld [vmem:[#allocation5 + $0x20] ss:$8 sps:$4 sm:$0xff]   ;;  %v283_v13 = vld [vmem:[#allocation5 + $0x14] ss:$8 sps:$4 sm:$0xff]  }
  0x20   :  { %v285_v14 = vld [vmem:[#allocation5 + $0x10] ss:$8 sps:$4 sm:$0xff]   ;;  %v286_v15 = vld [vmem:[#allocation5 + $0x4] ss:$8 sps:$4 sm:$0xff]   ;;  %v288_v16 = vld [vmem:[#allocation5] ss:$8 sps:$4 sm:$0xff]  }
  0x21   :  { %155 = vmatpush1.bf16.msra.mxu0 %v270_v4  ;;  %v42_v17 = vld [vmem:[#allocation2] sm:$0x1]  ;;  %v143_v20 = vshrl.u32 %v142_v19, 7  ;;  %v360_v34 = vmov 1966171168   ;;  %vm223_vm0 = vcmp.lt.s32.totalorder %v142_v19, 256 }
  0x22   :  { %156 = vmatprep.subr.bf16.mxu0 %v271_v5  ;;  %v43_v18 = vpack.c.bf16 %v42_v17, %v42_v17  ;;  %v60_v22 = vld [vmem:[%s396_s2] sm:$0x3]  ;;  %v207_v35 = vunpack.c.l.s4 %v360_v34  ;;  %s361_s2 = smov [#allocation7]  }
  0x23   :  { %v144_v21 = vsub.s32 0, %v143_v20  ;;  %v148_v23 = vsub.s32 1, %v143_v20  ;;  %s232_s25 = sshll.u32 %s361_s2, 4  ;;  %s233_s25 = int_to_ptr.vmem [resolvable:$true] %s232_s25 }
  0x24   :  { %v208_v41 = vunpack.c.0.s8 %v207_v35  ;;  %s329_s26 = scalar_lea.vmem %s233_s25, 32  ;;  %p334_p11 = scmp.lt.s32.totalorder %s233_s25, %s233_s25 }
  0x25   :  { %157 = vmatpush1.bf16.msra.mxu0 %v273_v6  ;;  %v145_v24 = vrot.slane %v60_v22, %v144_v21  ;;  %v149_v25 = vrot.slane %v60_v22, %v148_v23  ;;  %p330_p10 = scmp.ne.s32.totalorder %s233_s25, %s329_s26  ;;  %p335_p12 = scmp.lt.s32.totalorder %s329_s26, %s329_s26 }
  0x26   :  { %158 = vmatprep.subr.bf16.mxu0 %v274_v7  ;;  %v211_v45 = vsub.s32 %v208_v41, %v143_v20 }
  0x27   :  { %p336_p13 = por %p335_p12, %p334_p11 }
  0x29   :  { %159 = vmatpush1.bf16.msra.mxu0 %v276_v8  ;;  %p337_p0 = pnand %p336_p13, %p330_p10 }
  0x2a   :  { %160 = vmatprep.subr.bf16.mxu0 %v277_v9 }
  0x2d   :  { %161 = vmatpush1.bf16.msra.mxu0 %v279_v10 }
  0x2e   :  { %162 = vmatprep.subr.bf16.mxu0 %v280_v11 }
  0x31   :  { %163 = vmatpush1.bf16.msra.mxu0 %v282_v12 }
  0x32   :  { %164 = vmatprep.subr.bf16.mxu0 %v283_v13 }
  0x35   :  { %165 = vmatpush1.bf16.msra.mxu0 %v285_v14 }
  0x36   :  { %166 = vmatprep.subr.bf16.mxu0 %v286_v15 }
  0x39   :  { %167 = vmatpush1.bf16.msra.mxu0 %v288_v16 }
  0x3c   :  { %185 = vmatmul.mubr.bf16.vlgmr.msra.gmra.mxu0 %v43_v18 }
  0xfc   :  { %v186_v26 = vpop.f32.mrf.mxu0 }
  0xfd   :  { %v187_v27 = vadd.f32 %v186_v26, %v145_v24 }
  0xfe   :  { %v188_v28 = vpop.f32.mrf.mxu0 }
  0xff   :  { %v193_v29 = vadd.f32 3.0, %v187_v27  ;;  %v189_v30 = vadd.f32 %v188_v28, %v149_v25 }
 0x100   :  { %v190_v31 = vpop.f32.mrf.mxu0 }
 0x101   :  { %v195_v32 = vmax.f32 %v193_v29, 0.0  ;;  %v194_v33 = vadd.f32 3.0, %v189_v30 }
 0x102   :  { %v191_v36 = vpop.f32.mrf.mxu0 }
 0x103   :  { %v197_v37 = vmin.f32 %v195_v32, 6.0  ;;  %v196_v38 = vmax.f32 %v194_v33, 0.0 }
 0x105   :  { %v199_v39 = vmul.f32 %v197_v37, %v187_v27  ;;  %v198_v40 = vmin.f32 %v196_v38, 6.0 }
 0x107   :  { %v200_v42 = vmul.f32 %v198_v40, %v189_v30  ;;  %v201_v43 = vmul.f32 0.16666667, %v199_v39 }
 0x109   :  { %v202_v44 = vmul.f32 0.16666667, %v200_v42 }
 0x10b   :  { %v205_v46 = vcombine.low %v201_v43, %v202_v44 }
 0x10d   :  { %v212_v47 = vrot.slane %v205_v46, %v211_v45 }
 0x10f   :  { %v219_v48 = vrot.slane %v212_v47, %v211_v45 }
 0x111   :  { %225 = vst.msk [vmem:[#allocation7] sm:$0x3] %vm223_vm0, %v219_v48 }
 0x112   :  { %340 = shalt.err (!%p337_p0)
}
 0x113   :  { %235 = dma.vmem_to_hbm [thread:$0]  %s233_s25, 32, %s397_s3, [#allocation4]  }
 0x114   :  { %353 = dma.done.wait [#allocation4], 32  }
 0x115   :  { %354 = vsyncadd [#allocation4], 4294967264 }
 0x116   :  { %239 = vsyncpa [#allocation3], 1 }
 0x117   :  { %240 = vsyncpa [#allocation6], 1 }
 0x118   :  { %241 = vsyncpa [#allocation4], 1 }

</bundles_post_ra>
